<compile_context>
chip_gen: v7x
topology: tpu7x:2x2x1
jax: 0.10.0
libtpu: 0.0.40
codegen_flags: <defaults>
</compile_context>

<pallas_src>
import functools

import jax
import jax.numpy as jnp
from jax.experimental import pallas as pl
from jax.experimental.pallas import tpu as pltpu

_MIB = 1024 * 1024
_LANE = 128


def _rmsnorm_fwd_kernel(x_ref, w_ref, y_ref, *, eps, inv_n, low_precision_scale):
    # x_ref: (TM, N) row tile, w_ref: (1, N) weight, y_ref: (TM, N) output.
    x = x_ref[...]
    xf = x.astype(jnp.float32)
    # sum(x*x) * (1/N): per-row divide becomes one multiply; padded cols are 0.
    var = jnp.sum(xf * xf, axis=-1, keepdims=True) * inv_n
    rstd = jax.lax.rsqrt(var + eps)              # EUP rsqrt, rides a free slot
    if low_precision_scale:
        # bf16-capable VPU (v6e/v7x): scale in the I/O dtype. Only the reduction
        # runs in f32, so live f32 bytes per tile are halved; numeric deviation
        # vs. the all-f32 reference stays within bf16 rounding.
        xh = x * rstd.astype(x.dtype)
        y_ref[...] = (xh * w_ref[...].astype(x.dtype)).astype(y_ref.dtype)
    else:
        w = w_ref[...].astype(jnp.float32)       # (1, N) broadcasts over rows
        y_ref[...] = ((xf * rstd) * w).astype(y_ref.dtype)


@functools.lru_cache(maxsize=1)
def _device_kind():
    """Lowercased device_kind of the first device ('' if unavailable)."""
    try:
        devs = jax.devices()
        if devs:
            return str(getattr(devs[0], "device_kind", "")).lower()
    except Exception:
        pass
    return ""


def _vmem_capacity_bytes(kind):
    """Physical per-core VMEM; generation-aware fallback (v7x: 64 MiB, else 128 MiB)."""
    try:
        info = pltpu.get_tpu_info()
        for attr in ("vmem_capacity_bytes", "vmem_bytes", "vmem_size_bytes"):
            val = getattr(info, attr, None)
            if val:
                return int(val)
    except Exception:
        pass
    if "v7" in kind:
        return 64 * _MIB
    return 128 * _MIB  # v5e / v6e (and older) parts have 128 MiB per core


_SINGLE_TC_MARKERS = ("v5 lite", "v5e", "v5litepod", "v6 lite", "v6e")


def _is_multi_tensorcore(kind):
    """True on parts with 2 TensorCores per device (v7x; also v4/v5p megacore).

    Unknown kinds default to True: forcing an even step count >= 2 is nearly
    free on a single-TC part, while a single step idles one TC on v7x.
    """
    return not any(m in kind for m in _SINGLE_TC_MARKERS)


def _has_bf16_vpu(kind):
    """bf16 VPU arithmetic is native on v6e/v7x; v5e and older upcast to f32."""
    return not any(m in kind for m in ("v2", "v3", "v4", "v5 lite", "v5e", "v5litepod"))


def _pick_row_tile(M, N, dtype, vmem_capacity, multi_tc, low_precision_scale):
    """Row tile from the VMEM budget, dtype- and generation-aware."""
    itemsize = jnp.dtype(dtype).itemsize
    # Native sublane packing (preferred alignment); 8 is the hard minimum row block.
    sub = {4: 8, 2: 16, 1: 32}.get(itemsize, 8)
    min_rows = 8

    # Live VMEM bytes per tile row in flight: double-buffered input +
    # double-buffered output (I/O dtype) plus the f32 working copies the kernel
    # materializes (2 for f32 or the low-precision-scale path, ~3 for a full
    # f32 compute path on sub-32-bit inputs).
    f32_temps = 2 if (itemsize >= 4 or low_precision_scale) else 3
    bytes_per_row = 4 * N * itemsize + f32_temps * N * 4

    # Tighter budget factor on 64 MiB (v7x) parts so budget-max tiles keep
    # headroom under the scoped VMEM limit; roomier on 128 MiB parts.
    budget_factor = 0.5 if vmem_capacity <= 64 * _MIB else 0.6
    budget = int(budget_factor * vmem_capacity)

    # Huge-N guard: even the minimal row tile would blow the budget.
    # TODO(synk): add an N-blocked two-pass (sum-of-squares accumulator) fallback
    # instead of raising, for very wide hidden sizes on 64 MiB parts.
    if min(M, min_rows) * bytes_per_row > budget:
        raise RuntimeError(
            f"RMSNorm hidden dim N={N} is too wide for a single-pass row tile "
            f"within the ~{budget // _MIB} MiB VMEM budget on this TPU.")

    if M <= min_rows:
        # Tiny problem: one full-dim block. (On v7x one TC idles here, but a
        # <=8-row problem cannot be split below sublane granularity anyway.)
        return M

    tm = budget // bytes_per_row
    if tm >= sub:
        tm = (tm // sub) * sub          # align to native sublane packing
    else:
        tm = min_rows                   # guard above ensures this fits (approximately)

    # Mem-bound roofline saturates around the 512-row class; no point going huge.
    tm = min(tm, 1024)
    # Keep leading blocks full; only the last grid block may be partial.
    tm = min(tm, max(min_rows, (M // min_rows) * min_rows))

    if multi_tc:
        # Two TensorCores: make the "parallel" row-axis step count even and >= 2
        # so both cores stream an equal number of blocks. Single-TC parts skip
        # this (extra steps only add ~0.35 us each and shrink the tile).
        steps = -(-M // tm)
        if steps < 2 or steps % 2:
            desired = max(2, steps + (steps % 2))
            while True:
                cand = -(-M // desired)
                cand = -(-cand // min_rows) * min_rows
                cand = max(min_rows, min(cand, tm))
                got = -(-M // cand)
                if (got >= 2 and got % 2 == 0) or cand == min_rows:
                    tm = cand
                    break
                desired += 2
    return tm


def rmsnorm_pallas(x, weight, eps=1e-6, *, row_tile=None):
    """Matches AtorchRmsNormFunc.forward: rstd computed in f32, y = (x * rstd) * weight."""
    orig_shape = x.shape
    N = int(orig_shape[-1])
    x2d = x.reshape(-1, N)
    M = int(x2d.shape[0])
    w2d = weight.reshape(1, N)

    # Lane-dense hidden axis: pad N to a multiple of 128 only when needed so
    # output stores are full-lane (unmasked) vst. Zero-padded columns contribute
    # 0 to sum(x*x) and inv_n stays 1/true_N, so statistics are unchanged.
    n_pad = N if N % _LANE == 0 else ((N + _LANE - 1) // _LANE) * _LANE
    if n_pad != N:
        x2d = jnp.pad(x2d, ((0, 0), (0, n_pad - N)))
        w2d = jnp.pad(w2d, ((0, 0), (0, n_pad - N)))

    kind = _device_kind()
    vmem_capacity = _vmem_capacity_bytes(kind)
    multi_tc = _is_multi_tensorcore(kind)
    itemsize = jnp.dtype(x.dtype).itemsize
    low_precision_scale = (
        _has_bf16_vpu(kind)
        and jnp.issubdtype(x.dtype, jnp.floating)
        and itemsize == 2
    )

    tm = row_tile if row_tile is not None else _pick_row_tile(
        M, n_pad, x.dtype, vmem_capacity, multi_tc, low_precision_scale)

    # No host-side row padding: cdiv grid + masked partial-block stores handle a
    # ragged last row block (rows are fully independent).
    grid = (pl.cdiv(M, tm),)

    cost = pl.CostEstimate(
        flops=4 * M * N,                 # x*x, reduce-add, x*rstd, *w
        transcendentals=M,               # one rsqrt per row
        bytes_accessed=2 * M * n_pad * itemsize
        + n_pad * jnp.dtype(weight.dtype).itemsize,
    )

    # Scoped VMEM limit: tile data is budgeted at 0.5/0.6 of capacity, so 0.85
    # leaves real headroom for compiler scratch (≈54 MiB on v7x, ≈108 MiB on
    # 128 MiB parts).
    vmem_limit = min(int(0.85 * vmem_capacity), 112 * _MIB)

    kernel = functools.partial(
        _rmsnorm_fwd_kernel,
        eps=float(eps), inv_n=1.0 / float(N),
        low_precision_scale=low_precision_scale)

    def _run(single_buffer_weight):
        if single_buffer_weight:
            # Constant block index: one buffer is enough; frees one n_pad-wide
            # VMEM buffer and the per-step revisit bookkeeping.
            w_spec = pl.BlockSpec((1, n_pad), lambda i: (0, 0),
                                  pipeline_mode=pl.Buffered(1))
        else:
            w_spec = pl.BlockSpec((1, n_pad), lambda i: (0, 0))
        return pl.pallas_call(
            kernel,
            out_shape=jax.ShapeDtypeStruct((M, n_pad), x.dtype),
            grid_spec=pltpu.PrefetchScalarGridSpec(
                num_scalar_prefetch=0,
                grid=grid,
                in_specs=[
                    pl.BlockSpec((tm, n_pad), lambda i: (i, 0)),  # row tile of x
                    w_spec,                                       # resident weight
                ],
                out_specs=pl.BlockSpec((tm, n_pad), lambda i: (i, 0)),
            ),
            compiler_params=pltpu.CompilerParams(
                dimension_semantics=("parallel",),  # rows shard across TCs on v7x
                vmem_limit_bytes=vmem_limit,
            ),
            cost_estimate=cost,
        )(x2d, w2d)

    try:
        y2d = _run(True)
    except Exception:
        # Fallback for Pallas versions/specs that reject Buffered(1) on the
        # constant weight block: default double-buffering (tiny VMEM cost).
        y2d = _run(False)

    if n_pad != N:
        y2d = y2d[:, :N]
    return y2d.reshape(orig_shape)


class AtorchRmsNormJax:
    """JAX/Pallas equivalent of AtorchRmsNorm (forward only)."""

    def __init__(self, hidden_size, eps=1e-6, dtype=jnp.float32):
        # torch.nn.Parameter(torch.ones(hidden_size, dtype=dtype))
        self.weight = jnp.ones((hidden_size,), dtype=dtype)
        self.variance_epsilon = eps

    def __call__(self, x):
        return rmsnorm_pallas(x, self.weight, self.variance_epsilon)

    # TODO(synk): backward (_rms_norm_bwd_dx_fused / _rms_norm_bwd_dwdb) is not
    # needed for the forward pass; it would be separate Pallas kernels wired via
    # jax.custom_vjp (the Triton lock/atomic dw accumulation becomes a grid
    # reduction on TPU).


def _reference_rmsnorm(x, weight, eps):
    xf = x.astype(jnp.float32)
    var = jnp.mean(xf * xf, axis=-1, keepdims=True)
    rstd = 1.0 / jnp.sqrt(var + eps)
    return ((xf * rstd) * weight.astype(jnp.float32)).astype(x.dtype)


if __name__ == "__main__":
    key = jax.random.PRNGKey(0)
    k1, k2, k3, k4 = jax.random.split(key, 4)

    batch, seq, hidden = 2, 8, 128

    # Case 1: f32, M=16 rows, hidden already a lane multiple.
    x = jax.random.normal(k1, (batch, seq, hidden), dtype=jnp.float32)
    module = AtorchRmsNormJax(hidden_size=hidden, eps=1e-6, dtype=jnp.float32)
    module.weight = 0.5 + 0.01 * jnp.arange(hidden, dtype=jnp.float32)  # non-trivial
    y = module(x)
    jax.block_until_ready(y)
    y_ref = _reference_rmsnorm(x, module.weight, module.variance_epsilon)
    assert y.shape == x.shape and y.dtype == x.dtype
    assert jnp.allclose(y, y_ref, atol=1e-5, rtol=1e-5)

    # Case 2: ragged row count (M=20) -> cdiv grid with a masked partial last block.
    x2 = jax.random.normal(k2, (4, 5, hidden), dtype=jnp.float32)
    y2 = rmsnorm_pallas(x2, module.weight, 1e-6)
    jax.block_until_ready(y2)
    y2_ref = _reference_rmsnorm(x2, module.weight, 1e-6)
    assert jnp.allclose(y2, y2_ref, atol=1e-5, rtol=1e-5)

    # Case 3: bf16 input -> dtype-aware tiling and (on v6e/v7x) the
    # low-precision scale path.
    x3 = jax.random.normal(k3, (batch, seq, hidden), dtype=jnp.bfloat16)
    y3 = rmsnorm_pallas(x3, module.weight, 1e-6)
    jax.block_until_ready(y3)
    y3_ref = _reference_rmsnorm(x3, module.weight, 1e-6)
    assert y3.dtype == x3.dtype
    assert jnp.allclose(y3.astype(jnp.float32), y3_ref.astype(jnp.float32),
                        atol=3e-2, rtol=3e-2)

    # Case 4: hidden not a multiple of 128 (N=96) -> lane-padding path.
    hidden4 = 96
    w4 = 1.0 + 0.02 * jnp.arange(hidden4, dtype=jnp.float32)
    x4 = jax.random.normal(k4, (3, 4, hidden4), dtype=jnp.float32)
    y4 = rmsnorm_pallas(x4, w4, 1e-6)
    jax.block_until_ready(y4)
    y4_ref = _reference_rmsnorm(x4, w4, 1e-6)
    assert y4.shape == x4.shape
    assert jnp.allclose(y4, y4_ref, atol=1e-5, rtol=1e-5)

    print("KERNEL_OK")
</pallas_src>

<mosaic_0001>
module attributes {stable_mosaic.version = 11 : i64} {
  func.func @_rmsnorm_fwd_kernel(%arg0: i32, %arg1: memref<8x128xf32, #tpu.memory_space<vmem>>, %arg2: memref<1x128xf32, #tpu.memory_space<vmem>>, %arg3: memref<8x128xf32, #tpu.memory_space<vmem>>) attributes {dimension_semantics = [#tpu.dimension_semantics<parallel>], iteration_bounds = array<i64: 2>, scalar_prefetch = 0 : i64, scratch_operands = 0 : i64, tpu.core_type = #tpu.core_type<tc>, window_params = [{transform_indices = @transform_0, window_bounds = array<i64: 8, 128>}, {pipeline_mode = #tpu.pipeline_mode<synchronous>, transform_indices = @transform_1, window_bounds = array<i64: 1, 128>}, {transform_indices = @transform_2, window_bounds = array<i64: 8, 128>}]} {
    %c0 = arith.constant 0 : index
    %c0_0 = arith.constant 0 : index
    %0 = vector.load %arg1[%c0, %c0_0] : memref<8x128xf32, #tpu.memory_space<vmem>>, vector<8x128xf32>
    %1 = arith.mulf %0, %0 : vector<8x128xf32>
    %cst = arith.constant dense<0.000000e+00> : vector<8xf32>
    %2 = vector.multi_reduction <add>, %1, %cst [1] : vector<8x128xf32> to vector<8xf32>
    %3 = vector.shape_cast %2 : vector<8xf32> to vector<8x1xf32>
    %cst_1 = arith.constant 7.812500e-03 : f32
    %4 = vector.broadcast %cst_1 : f32 to vector<8x1xf32>
    %5 = arith.mulf %3, %4 : vector<8x1xf32>
    %cst_2 = arith.constant 9.99999997E-7 : f32
    %6 = vector.broadcast %cst_2 : f32 to vector<8x1xf32>
    %7 = arith.addf %5, %6 : vector<8x1xf32>
    %8 = math.rsqrt %7 : vector<8x1xf32>
    %c0_3 = arith.constant 0 : index
    %c0_4 = arith.constant 0 : index
    %9 = vector.load %arg2[%c0_3, %c0_4] : memref<1x128xf32, #tpu.memory_space<vmem>>, vector<1x128xf32>
    %10 = vector.broadcast %8 : vector<8x1xf32> to vector<8x128xf32>
    %11 = arith.mulf %0, %10 : vector<8x128xf32>
    %12 = vector.broadcast %9 : vector<1x128xf32> to vector<8x128xf32>
    %13 = arith.mulf %11, %12 : vector<8x128xf32>
    %c0_5 = arith.constant 0 : index
    %c0_6 = arith.constant 0 : index
    %14 = vector.load %arg3[%c0_5, %c0_6] : memref<8x128xf32, #tpu.memory_space<vmem>>, vector<8x128xf32>
    tpu.vector_store %arg3[%c0_5, %c0_6], %13 {strides = array<i32>} : memref<8x128xf32, #tpu.memory_space<vmem>>, vector<8x128xf32>,
    return
  }
  func.func @transform_0(%arg0: i32) -> (i32, i32) {
    %c0_i32 = arith.constant 0 : i32
    %c0_i32_0 = arith.constant 0 : i32
    return %arg0, %c0_i32 : i32, i32
  }
  func.func @transform_1(%arg0: i32) -> (i32, i32) {
    %c0_i32 = arith.constant 0 : i32
    %c0_i32_0 = arith.constant 0 : i32
    %c0_i32_1 = arith.constant 0 : i32
    return %c0_i32, %c0_i32_0 : i32, i32
  }
  func.func @transform_2(%arg0: i32) -> (i32, i32) {
    %c0_i32 = arith.constant 0 : i32
    %c0_i32_0 = arith.constant 0 : i32
    return %arg0, %c0_i32 : i32, i32
  }
}

module attributes {stable_mosaic.version = 11 : i64} {
  func.func @_rmsnorm_fwd_kernel(%arg0: i32, %arg1: memref<8x128xf32, #tpu.memory_space<vmem>>, %arg2: memref<1x128xf32, #tpu.memory_space<vmem>>, %arg3: memref<8x128xf32, #tpu.memory_space<vmem>>) attributes {dimension_semantics = [#tpu.dimension_semantics<parallel>], iteration_bounds = array<i64: 2>, scalar_prefetch = 0 : i64, scratch_operands = 0 : i64, tpu.core_type = #tpu.core_type<tc>, window_params = [{transform_indices = @transform_0, window_bounds = array<i64: 8, 128>}, {pipeline_mode = #tpu.pipeline_mode<synchronous>, transform_indices = @transform_1, window_bounds = array<i64: 1, 128>}, {transform_indices = @transform_2, window_bounds = array<i64: 8, 128>}]} {
    %c0 = arith.constant 0 : index
    %c0_0 = arith.constant 0 : index
    %0 = vector.load %arg1[%c0, %c0_0] : memref<8x128xf32, #tpu.memory_space<vmem>>, vector<8x128xf32>
    %1 = arith.mulf %0, %0 : vector<8x128xf32>
    %cst = arith.constant dense<0.000000e+00> : vector<8xf32>
    %2 = vector.multi_reduction <add>, %1, %cst [1] : vector<8x128xf32> to vector<8xf32>
    %3 = vector.shape_cast %2 : vector<8xf32> to vector<8x1xf32>
    %cst_1 = arith.constant 7.812500e-03 : f32
    %4 = vector.broadcast %cst_1 : f32 to vector<8x1xf32>
    %5 = arith.mulf %3, %4 : vector<8x1xf32>
    %cst_2 = arith.constant 9.99999997E-7 : f32
    %6 = vector.broadcast %cst_2 : f32 to vector<8x1xf32>
    %7 = arith.addf %5, %6 : vector<8x1xf32>
    %8 = math.rsqrt %7 : vector<8x1xf32>
    %c0_3 = arith.constant 0 : index
    %c0_4 = arith.constant 0 : index
    %9 = vector.load %arg2[%c0_3, %c0_4] : memref<1x128xf32, #tpu.memory_space<vmem>>, vector<1x128xf32>
    %10 = vector.broadcast %8 : vector<8x1xf32> to vector<8x128xf32>
    %11 = arith.mulf %0, %10 : vector<8x128xf32>
    %12 = vector.broadcast %9 : vector<1x128xf32> to vector<8x128xf32>
    %13 = arith.mulf %11, %12 : vector<8x128xf32>
    %c0_5 = arith.constant 0 : index
    %c0_6 = arith.constant 0 : index
    %14 = vector.load %arg3[%c0_5, %c0_6] : memref<8x128xf32, #tpu.memory_space<vmem>>, vector<8x128xf32>
    tpu.vector_store %arg3[%c0_5, %c0_6], %13 {strides = array<i32>} : memref<8x128xf32, #tpu.memory_space<vmem>>, vector<8x128xf32>,
    return
  }
  func.func @transform_0(%arg0: i32) -> (i32, i32) {
    %c0_i32 = arith.constant 0 : i32
    %c0_i32_0 = arith.constant 0 : i32
    return %arg0, %c0_i32 : i32, i32
  }
  func.func @transform_1(%arg0: i32) -> (i32, i32) {
    %c0_i32 = arith.constant 0 : i32
    %c0_i32_0 = arith.constant 0 : i32
    %c0_i32_1 = arith.constant 0 : i32
    return %c0_i32, %c0_i32_0 : i32, i32
  }
  func.func @transform_2(%arg0: i32) -> (i32, i32) {
    %c0_i32 = arith.constant 0 : i32
    %c0_i32_0 = arith.constant 0 : i32
    return %arg0, %c0_i32 : i32, i32
  }
}

</mosaic_0001>

<bundles_post_ra>
// kernel: tpu_custom_call.1
= control target key start
LH: loop header
LB: loop body
LE: loop exit
PB: predicated region body
PF: predicated region fallthrough
CT: control target
= control target key end

     0   :  { %7 = vsyncpa [#allocation3], 0  ;;  %s706_s0 = inlined_call_operand.hbm [shape: f32[16,128], index: 0, kind: input, shape index: {}]   ;;  %s707_s1 = inlined_call_operand.hbm [shape: f32[1,128], index: 1, kind: input, shape index: {}]   ;;  %s708_s2 = inlined_call_operand.hbm [shape: f32[16,128], index: 2, kind: output, shape index: {}]  }
   0x1   :  { %9 = vsyncpa [#allocation3 + $0x1], 0 }
   0x2   :  { %10 = vsyncpa [#allocation6], 0 }
   0x3   :  { %11 = vsyncpa [#allocation4], 0 }
   0x4   :  { %13 = vsyncpa [#allocation4 + $0x1], 0  ;;  %s505_s9 = smov 0   ;;  %s507_s10 = smov 0  }
   0x5   :  { %s509_s11 = smov 0   ;;  %s511_s12 = smov 0  }
   0x6 LB: > { %s526_s13 = sadd.s32 4294967295, %s485_s12   ;;  %s283_s14 = sadd.s32 4294967294, %s485_s12   ;;  %s485_s12 = sphi %s511_s12, %s732_s12   ;;  %s481_s11 = sphi %s509_s11, %s731_s11   ;;  %s477_s10 = sphi %s507_s10, %s730_s10   ;;  %s473_s9 = sphi %s505_s9, %s729_s9  }
   0x7   : > { %p39_p0 = scmp.ne.s32.totalorder %s477_s10, %s473_s9  ;;  %p709_p1 = scmp.eq.s32.totalorder %s526_s13, 0 }
   0x8   : > { %p90_p3 = scmp.eq.s32.totalorder %s283_s14, 1  ;;  %p284_p5 = scmp.ge.s32.totalorder %s485_s12, 1 }
   0x9   : > { %p535_p4 = por %p709_p1, %p39_p0  ;;  %p97_p7 = scmp.lt.s32.totalorder %s485_s12, 3 }
   0xa   : > { %p540_p6 = por %p90_p3, %p39_p0  ;;  %s487_s18 = smov [#allocation5]  }
   0xb   : > { %s712_s15 = scalar_select %p535_p4, 1, 0 }
   0xc   : > { %s713_s16 = scalar_select %p540_p6, 1, 0 }
   0xd   : > { %p545_p8 = pnand %p284_p5, %p97_p7  ;;  %s110_s19 = sshll.u32 %s487_s18, 4  ;;  %s111_s19 = int_to_ptr.vmem [resolvable:$true] %s110_s19 }
   0xe   : > { %s553_s20 = sadd.s32 1, %s485_s12   ;;  %s26_s24 = sadd.s32 1, %s481_s11 }
   0xf   : > { %s714_s17 = scalar_select %p545_p8, 1, 0 }
  0x10   : > { %p306_p10 = pneg %p545_p8  ;;  %s23_s22 = ssub.s32 %s485_s12, %s553_s20 }
  0x11   : > { %p563_p12 = scmp.eq.s32.totalorder %s23_s22, 0  ;;  %s357_s27 = scalar_lea.hbm %s707_s1, 16 }
  0x12   : > { %p557_p11 = pnand %p306_p10, %p709_p1  ;;  %p358_p0 = scmp.ne.s32.totalorder %s707_s1, %s357_s27 }
  0x13   : > { %s716_s23 = scalar_select %p563_p12, 1, 0 }
  0x14   : > { %p359_p3 = pneg %p557_p11  ;;  %p364_p10 = scmp.lt.u32.totalorder %s357_s27, %s707_s1 }
  0x16   : > { %p360_p5 = pnand %p359_p3, %p358_p0 }
  0x18   : > { %p361_p7 = pneg %p360_p5 }
  0x1a   : > { %p366_p9 = pnand %p364_p10, %p361_p7 }
  0x1c   : > { %369 = shalt.err (!%p366_p9)
}
  0x1d   : > { %s370_s4 = scalar_lea.vmem %s111_s19, 16  ;;  %s377_s5 = scalar_lea.vmem %s111_s19, 32 }
  0x1e   : > { %p371_p1 = scmp.ne.s32.totalorder %s111_s19, %s370_s4  ;;  %p378_p6 = scmp.lt.s32.totalorder %s111_s19, %s111_s19 }
  0x1f   : > { %p379_p4 = scmp.lt.s32.totalorder %s377_s5, %s370_s4 }
  0x20   : > { %p373_p2 = pnand %p371_p1, %p359_p3 }
  0x21   : > { %p380_p8 = por %p379_p4, %p378_p6 }
  0x22   : > { %p374_p13 = pneg %p373_p2 }
  0x24   : > { %p381_p12 = pnand %p380_p8, %p374_p13 }
  0x26   : > { %384 = shalt.err (!%p381_p12)
}
  0x27   : > { %309 = dma.hbm_to_vmem [thread:$0]  (!%p557_p11), %s707_s1, 16, %s111_s19, [#allocation6]  }
  0x28   : > { %p717_p1 = scmp.ne.s32.totalorder %s716_s23, 0  ;;  %p34_p2 = scmp.eq.s32.totalorder %s485_s12, 0 }
  0x29   : > { %p718_p4 = scmp.ne.s32.totalorder %s481_s11, %s477_s10  ;;  %p719_p6 = scmp.eq.s32.totalorder %s526_s13, 1 }
  0x2a   : > { %s589_s8 = scalar_select %p717_p1, %s481_s11, %s26_s24  }
  0x2b   : > { %p597_p8 = por %p719_p6, %p718_p4  ;;  %p319_p9 = scmp.lt.s32.totalorder %s485_s12, 2 }
  0x2c   : > { %s121_s18 = sand.u32 1, %s481_s11   ;;  %p721_p12 = pmov %p718_p4 }
  0x2d   : > { %s287_s21 = sshll.u32 %s121_s18, 3  ;;  %s288_s22 = sshll.u32 %s485_s12, 7 }
  0x2e   : > { %p35_p13 = por %p34_p2, %p721_p12  ;;  %s610_s19 = scalar_lea.hbm %s706_s0, %s288_s22 }
  0x2f   : > { %s125_s23 = scalar_lea.vmem [#allocation2], %s287_s21  ;;  %s122_s28 = scalar_lea.sflag [#allocation3], %s121_s18 }
  0x30   : > { %s132_s24 = sshll.u32 %s125_s23, 4  ;;  %p612_p11 = pnand %p319_p9, %p35_p13  ;;  %s616_s24 = int_to_ptr.vmem [resolvable:$true] %s132_s24 }
  0x31   : > { %s385_s29 = scalar_lea.hbm %s610_s19, 128  ;;  %s390_s4 = scalar_lea.hbm %s706_s0, 256 }
  0x32   : > { %p386_p0 = scmp.ne.s32.totalorder %s610_s19, %s385_s29  ;;  %p387_p3 = pneg %p612_p11 }
  0x33   : > { %p391_p10 = scmp.lt.u32.totalorder %s610_s19, %s706_s0  ;;  %p392_p1 = scmp.lt.u32.totalorder %s390_s4, %s385_s29 }
  0x34   : > { %p388_p5 = pnand %p387_p3, %p386_p0  ;;  %p394_p4 = scmp.lt.u32.totalorder %s385_s29, %s610_s19 }
  0x35   : > { %p393_p2 = por %p392_p1, %p391_p10 }
  0x36   : > { %p389_p7 = pneg %p388_p5 }
  0x37   : > { %p395_p6 = por %p394_p4, %p393_p2 }
  0x39   : > { %p396_p9 = pnand %p395_p6, %p389_p7 }
  0x3b   : > { %399 = shalt.err (!%p396_p9)
}
  0x3c   : > { %s400_s7 = scalar_lea.vmem %s616_s24, 128  ;;  %s488_s18 = smov [#allocation2]  }
  0x3d   : > { %p401_p12 = scmp.ne.s32.totalorder %s616_s24, %s400_s7  ;;  %s405_s21 = sshll.u32 %s488_s18, 4  ;;  %s406_s21 = int_to_ptr.vmem [resolvable:$false] %s405_s21 }
  0x3e   : > { %s407_s22 = scalar_lea.vmem %s406_s21, 256  ;;  %p408_p5 = scmp.lt.s32.totalorder %s616_s24, %s406_s21 }
  0x3f   : > { %p403_p13 = pnand %p401_p12, %p387_p3  ;;  %p409_p10 = scmp.lt.s32.totalorder %s407_s22, %s400_s7 }
  0x41   : > { %p404_p0 = pneg %p403_p13  ;;  %p410_p1 = por %p409_p10, %p408_p5 }
  0x43   : > { %p411_p2 = pnand %p410_p1, %p404_p0 }
  0x45   : > { %414 = shalt.err (!%p411_p2)
}
  0x46   : > { %313 = dma.hbm_to_vmem [thread:$0]  (!%p612_p11), %s610_s19, 128, %s616_s24, %s122_s28  }
  0x47   : > { %p723_p7 = scmp.ne.s32.totalorder %s714_s17, 0 }
  0x48   : > { %s646_s25 = sand.u32 (!%p723_p7), 1, %s477_s10   ;;  %p724_p3 = scmp.ne.s32.totalorder (!%p723_p7), %s712_s15, 0 }
  0x49   : > { %141 = sbr.rel (%p723_p7) target bundleno = 262 (0x106), region = 28  ;;  %s290_s26 = sshll.u32 (!%p723_p7), %s646_s25, 3 }
  0x4a   : > { %s144_s23 = scalar_lea.sflag (!%p723_p7), [#allocation3], %s646_s25  ;;  %s147_s29 = scalar_lea.vmem (!%p723_p7), [#allocation2], %s290_s26 }
  0x50   : > { %460 = dma.done.wait (%p724_p3), %s144_s23, 128  }
  0x51   : > { %462 = vsyncadd (%p724_p3), %s144_s23, 4294967168  ;;  %p725_p4 = scmp.eq.s32.totalorder %s526_s13, 0 }
  0x53   : > { %464 = dma.done.wait (%p725_p4), [#allocation6], 16   ;;  %p726_p11 = pmov %p725_p4 }
  0x54   : > { %v172_v0 = vld [vmem:[%s147_s29] sm:$0xff]  ;;  %v293_v6 = vld [vmem:[#allocation5] ss:$0 sm:$0xff]  ;;  %s295_s15 = sshll.u32 %s526_s13, 7  ;;  %s171_s17 = scalar_lea.vmem [#allocation7], %s290_s26 }
  0x55   : > { %466 = vsyncadd (%p726_p11), [#allocation6], 4294967280  ;;  %v173_v1 = vmul.f32 %v172_v0, %v172_v0  ;;  %s203_s19 = sshll.u32 %s171_s17, 4  ;;  %s662_s28 = scalar_lea.hbm %s708_s2, %s295_s15  ;;  %s664_s19 = int_to_ptr.vmem [resolvable:$true] %s203_s19 }
  0x56   : > { %s190_s30 = scalar_lea.sflag [#allocation4], %s646_s25  ;;  %s415_s3 = scalar_lea.vmem %s664_s19, 128 }
  0x57   : > { %174 = vadd.xlane.f32.xlu0 %v173_v1  ;;  %p416_p6 = scmp.ne.s32.totalorder %s664_s19, %s415_s3  ;;  %s489_s13 = smov [#allocation7]  }
  0x58   : > { %s419_s4 = sshll.u32 %s489_s13, 4  ;;  %s420_s4 = int_to_ptr.vmem [resolvable:$false] %s419_s4 }
  0x59   : > { %p417_p9 = pnand %p416_p6, %p597_p8  ;;  %s421_s5 = scalar_lea.vmem %s420_s4, 256 }
  0x5a   : > { %p422_p13 = scmp.lt.s32.totalorder %s664_s19, %s420_s4  ;;  %p423_p0 = scmp.lt.s32.totalorder %s421_s5, %s415_s3 }
  0x5b   : > { %p418_p12 = pneg %p417_p9 }
  0x5c   : > { %p424_p5 = por %p423_p0, %p422_p13 }
  0x5e   : > { %p425_p10 = pnand %p424_p5, %p418_p12 }
  0xe4   : > { %v175_v2 = vpop.xlane.xlu0 %174 }
  0xe5   : > { %v176_v3 = vmul.f32 0.0078125, %v175_v2 }
  0xe7   : > { %v177_v4 = vadd.f32 1e-06, %v176_v3 }
  0xe9   : > { %355 = vrsqrt.f32 %v177_v4 }
  0xf3   : > { %v356_v5 = vpop.eup %355 }
  0xf4   : > { %v180_v7 = vmul.f32 %v356_v5, %v172_v0 }
  0xf6   : > { %v187_v8 = vmul.f32 %v293_v6, %v180_v7 }
  0xf8   : > { %188 = vst [vmem:[%s171_s17] sm:$0xff] %v187_v8 }
  0xf9   : > { %428 = shalt.err (!%p425_p10)
}
  0xfa   : > { %s429_s6 = scalar_lea.hbm %s662_s28, 128  ;;  %s433_s21 = scalar_lea.hbm %s708_s2, 256 }
  0xfb   : > { %p430_p1 = scmp.ne.s32.totalorder %s662_s28, %s429_s6  ;;  %p434_p3 = scmp.lt.u32.totalorder %s662_s28, %s708_s2 }
  0xfc   : > { %p435_p4 = scmp.lt.u32.totalorder %s433_s21, %s429_s6  ;;  %p437_p6 = scmp.lt.u32.totalorder %s429_s6, %s662_s28 }
  0xfd   : > { %p431_p2 = pnand %p430_p1, %p597_p8 }
  0xfe   : > { %p436_p11 = por %p435_p4, %p434_p3 }
  0xff   : > { %p432_p7 = pneg %p431_p2 }
 0x100   : > { %p438_p9 = por %p437_p6, %p436_p11 }
 0x102   : > { %p439_p12 = pnand %p438_p9, %p432_p7 }
 0x104   : > { %442 = shalt.err (!%p439_p12)
}
 0x105   : > { %304 = dma.vmem_to_hbm [thread:$0]  (%p597_p8), %s664_s19, 128, %s662_s28, %s190_s30  }
 0x106 PF: > { %s215_s26 = sand.u32 1, %s473_s9   ;;  %p727_p13 = scmp.ne.s32.totalorder %s713_s16, 0 }
 0x107   : > { %p728_p0 = scmp.ge.s32.totalorder %s485_s12, 2  ;;  %s216_s23 = scalar_lea.sflag [#allocation4], %s215_s26 }
 0x109   : > { %p315_p5 = pnand %p728_p0, %p727_p13 }
 0x10b   : > { %468 = dma.done.wait (!%p315_p5), %s216_s23, 128  }
 0x10c   : > { %470 = vsyncadd (!%p315_p5), %s216_s23, 4294967168  ;;  %p16_p10 = scmp.ge.s32.totalorder %s553_s20, 4   ;;  %s729_s9 = smov %s477_s10 }
 0x10d   : > { %s730_s10 = smov %s481_s11  ;;  %s731_s11 = smov %s589_s8 }
 0x10e   : > { %s732_s12 = smov %s553_s20  ;;  %18 = sbr.rel (!%p16_p10) target bundleno = 6 (0x6), region = 77 }
 0x115   :  { %221 = vsyncpa [#allocation3], 1 }
 0x116   :  { %223 = vsyncpa [#allocation3 + $0x1], 1 }
 0x117   :  { %224 = vsyncpa [#allocation6], 1 }
 0x118   :  { %225 = vsyncpa [#allocation4], 1 }
 0x119   :  { %227 = vsyncpa [#allocation4 + $0x1], 1 }

// kernel: tpu_custom_call.1
= control target key start
LH: loop header
LB: loop body
LE: loop exit
PB: predicated region body
PF: predicated region fallthrough
CT: control target
= control target key end

     0   :  { %7 = vsyncpa [#allocation3], 0  ;;  %s706_s0 = inlined_call_operand.hbm [shape: f32[16,128], index: 0, kind: input, shape index: {}]   ;;  %s707_s1 = inlined_call_operand.hbm [shape: f32[1,128], index: 1, kind: input, shape index: {}]   ;;  %s708_s2 = inlined_call_operand.hbm [shape: f32[16,128], index: 2, kind: output, shape index: {}]  }
   0x1   :  { %9 = vsyncpa [#allocation3 + $0x1], 0 }
   0x2   :  { %10 = vsyncpa [#allocation6], 0 }
   0x3   :  { %11 = vsyncpa [#allocation4], 0 }
   0x4   :  { %13 = vsyncpa [#allocation4 + $0x1], 0  ;;  %s505_s9 = smov 0   ;;  %s507_s10 = smov 0  }
   0x5   :  { %s509_s11 = smov 0   ;;  %s511_s12 = smov 0  }
   0x6 LB: > { %s526_s13 = sadd.s32 4294967295, %s485_s12   ;;  %s283_s14 = sadd.s32 4294967294, %s485_s12   ;;  %s485_s12 = sphi %s511_s12, %s732_s12   ;;  %s481_s11 = sphi %s509_s11, %s731_s11   ;;  %s477_s10 = sphi %s507_s10, %s730_s10   ;;  %s473_s9 = sphi %s505_s9, %s729_s9  }
   0x7   : > { %p39_p0 = scmp.ne.s32.totalorder %s477_s10, %s473_s9  ;;  %p709_p1 = scmp.eq.s32.totalorder %s526_s13, 0 }
   0x8   : > { %p90_p3 = scmp.eq.s32.totalorder %s283_s14, 1  ;;  %p284_p5 = scmp.ge.s32.totalorder %s485_s12, 1 }
   0x9   : > { %p535_p4 = por %p709_p1, %p39_p0  ;;  %p97_p7 = scmp.lt.s32.totalorder %s485_s12, 3 }
   0xa   : > { %p540_p6 = por %p90_p3, %p39_p0  ;;  %s487_s18 = smov [#allocation5]  }
   0xb   : > { %s712_s15 = scalar_select %p535_p4, 1, 0 }
   0xc   : > { %s713_s16 = scalar_select %p540_p6, 1, 0 }
   0xd   : > { %p545_p8 = pnand %p284_p5, %p97_p7  ;;  %s110_s19 = sshll.u32 %s487_s18, 4  ;;  %s111_s19 = int_to_ptr.vmem [resolvable:$true] %s110_s19 }
   0xe   : > { %s553_s20 = sadd.s32 1, %s485_s12   ;;  %s26_s24 = sadd.s32 1, %s481_s11 }
   0xf   : > { %s714_s17 = scalar_select %p545_p8, 1, 0 }
  0x10   : > { %p306_p10 = pneg %p545_p8  ;;  %s23_s22 = ssub.s32 %s485_s12, %s553_s20 }
  0x11   : > { %p563_p12 = scmp.eq.s32.totalorder %s23_s22, 0  ;;  %s357_s27 = scalar_lea.hbm %s707_s1, 16 }
  0x12   : > { %p557_p11 = pnand %p306_p10, %p709_p1  ;;  %p358_p0 = scmp.ne.s32.totalorder %s707_s1, %s357_s27 }
  0x13   : > { %s716_s23 = scalar_select %p563_p12, 1, 0 }
  0x14   : > { %p359_p3 = pneg %p557_p11  ;;  %p364_p10 = scmp.lt.u32.totalorder %s357_s27, %s707_s1 }
  0x16   : > { %p360_p5 = pnand %p359_p3, %p358_p0 }
  0x18   : > { %p361_p7 = pneg %p360_p5 }
  0x1a   : > { %p366_p9 = pnand %p364_p10, %p361_p7 }
  0x1c   : > { %369 = shalt.err (!%p366_p9)
}
  0x1d   : > { %s370_s4 = scalar_lea.vmem %s111_s19, 16  ;;  %s377_s5 = scalar_lea.vmem %s111_s19, 32 }
  0x1e   : > { %p371_p1 = scmp.ne.s32.totalorder %s111_s19, %s370_s4  ;;  %p378_p6 = scmp.lt.s32.totalorder %s111_s19, %s111_s19 }
  0x1f   : > { %p379_p4 = scmp.lt.s32.totalorder %s377_s5, %s370_s4 }
  0x20   : > { %p373_p2 = pnand %p371_p1, %p359_p3 }
  0x21   : > { %p380_p8 = por %p379_p4, %p378_p6 }
  0x22   : > { %p374_p13 = pneg %p373_p2 }
  0x24   : > { %p381_p12 = pnand %p380_p8, %p374_p13 }
  0x26   : > { %384 = shalt.err (!%p381_p12)
}
  0x27   : > { %309 = dma.hbm_to_vmem [thread:$0]  (!%p557_p11), %s707_s1, 16, %s111_s19, [#allocation6]  }
  0x28   : > { %p717_p1 = scmp.ne.s32.totalorder %s716_s23, 0  ;;  %p34_p2 = scmp.eq.s32.totalorder %s485_s12, 0 }
  0x29   : > { %p718_p4 = scmp.ne.s32.totalorder %s481_s11, %s477_s10  ;;  %p719_p6 = scmp.eq.s32.totalorder %s526_s13, 1 }
  0x2a   : > { %s589_s8 = scalar_select %p717_p1, %s481_s11, %s26_s24  }
  0x2b   : > { %p597_p8 = por %p719_p6, %p718_p4  ;;  %p319_p9 = scmp.lt.s32.totalorder %s485_s12, 2 }
  0x2c   : > { %s121_s18 = sand.u32 1, %s481_s11   ;;  %p721_p12 = pmov %p718_p4 }
  0x2d   : > { %s287_s21 = sshll.u32 %s121_s18, 3  ;;  %s288_s22 = sshll.u32 %s485_s12, 7 }
  0x2e   : > { %p35_p13 = por %p34_p2, %p721_p12  ;;  %s610_s19 = scalar_lea.hbm %s706_s0, %s288_s22 }
  0x2f   : > { %s125_s23 = scalar_lea.vmem [#allocation2], %s287_s21  ;;  %s122_s28 = scalar_lea.sflag [#allocation3], %s121_s18 }
  0x30   : > { %s132_s24 = sshll.u32 %s125_s23, 4  ;;  %p612_p11 = pnand %p319_p9, %p35_p13  ;;  %s616_s24 = int_to_ptr.vmem [resolvable:$true] %s132_s24 }
  0x31   : > { %s385_s29 = scalar_lea.hbm %s610_s19, 128  ;;  %s390_s4 = scalar_lea.hbm %s706_s0, 256 }
  0x32   : > { %p386_p0 = scmp.ne.s32.totalorder %s610_s19, %s385_s29  ;;  %p387_p3 = pneg %p612_p11 }
  0x33   : > { %p391_p10 = scmp.lt.u32.totalorder %s610_s19, %s706_s0  ;;  %p392_p1 = scmp.lt.u32.totalorder %s390_s4, %s385_s29 }
  0x34   : > { %p388_p5 = pnand %p387_p3, %p386_p0  ;;  %p394_p4 = scmp.lt.u32.totalorder %s385_s29, %s610_s19 }
  0x35   : > { %p393_p2 = por %p392_p1, %p391_p10 }
  0x36   : > { %p389_p7 = pneg %p388_p5 }
  0x37   : > { %p395_p6 = por %p394_p4, %p393_p2 }
  0x39   : > { %p396_p9 = pnand %p395_p6, %p389_p7 }
  0x3b   : > { %399 = shalt.err (!%p396_p9)
}
  0x3c   : > { %s400_s7 = scalar_lea.vmem %s616_s24, 128  ;;  %s488_s18 = smov [#allocation2]  }
  0x3d   : > { %p401_p12 = scmp.ne.s32.totalorder %s616_s24, %s400_s7  ;;  %s405_s21 = sshll.u32 %s488_s18, 4  ;;  %s406_s21 = int_to_ptr.vmem [resolvable:$false] %s405_s21 }
  0x3e   : > { %s407_s22 = scalar_lea.vmem %s406_s21, 256  ;;  %p408_p5 = scmp.lt.s32.totalorder %s616_s24, %s406_s21 }
  0x3f   : > { %p403_p13 = pnand %p401_p12, %p387_p3  ;;  %p409_p10 = scmp.lt.s32.totalorder %s407_s22, %s400_s7 }
  0x41   : > { %p404_p0 = pneg %p403_p13  ;;  %p410_p1 = por %p409_p10, %p408_p5 }
  0x43   : > { %p411_p2 = pnand %p410_p1, %p404_p0 }
  0x45   : > { %414 = shalt.err (!%p411_p2)
}
  0x46   : > { %313 = dma.hbm_to_vmem [thread:$0]  (!%p612_p11), %s610_s19, 128, %s616_s24, %s122_s28  }
  0x47   : > { %p723_p7 = scmp.ne.s32.totalorder %s714_s17, 0 }
  0x48   : > { %s646_s25 = sand.u32 (!%p723_p7), 1, %s477_s10   ;;  %p724_p3 = scmp.ne.s32.totalorder (!%p723_p7), %s712_s15, 0 }
  0x49   : > { %141 = sbr.rel (%p723_p7) target bundleno = 262 (0x106), region = 28  ;;  %s290_s26 = sshll.u32 (!%p723_p7), %s646_s25, 3 }
  0x4a   : > { %s144_s23 = scalar_lea.sflag (!%p723_p7), [#allocation3], %s646_s25  ;;  %s147_s29 = scalar_lea.vmem (!%p723_p7), [#allocation2], %s290_s26 }
  0x50   : > { %460 = dma.done.wait (%p724_p3), %s144_s23, 128  }
  0x51   : > { %462 = vsyncadd (%p724_p3), %s144_s23, 4294967168  ;;  %p725_p4 = scmp.eq.s32.totalorder %s526_s13, 0 }
  0x53   : > { %464 = dma.done.wait (%p725_p4), [#allocation6], 16   ;;  %p726_p11 = pmov %p725_p4 }
  0x54   : > { %v172_v0 = vld [vmem:[%s147_s29] sm:$0xff]  ;;  %v293_v6 = vld [vmem:[#allocation5] ss:$0 sm:$0xff]  ;;  %s295_s15 = sshll.u32 %s526_s13, 7  ;;  %s171_s17 = scalar_lea.vmem [#allocation7], %s290_s26 }
  0x55   : > { %466 = vsyncadd (%p726_p11), [#allocation6], 4294967280  ;;  %v173_v1 = vmul.f32 %v172_v0, %v172_v0  ;;  %s203_s19 = sshll.u32 %s171_s17, 4  ;;  %s662_s28 = scalar_lea.hbm %s708_s2, %s295_s15  ;;  %s664_s19 = int_to_ptr.vmem [resolvable:$true] %s203_s19 }
  0x56   : > { %s190_s30 = scalar_lea.sflag [#allocation4], %s646_s25  ;;  %s415_s3 = scalar_lea.vmem %s664_s19, 128 }
  0x57   : > { %174 = vadd.xlane.f32.xlu0 %v173_v1  ;;  %p416_p6 = scmp.ne.s32.totalorder %s664_s19, %s415_s3  ;;  %s489_s13 = smov [#allocation7]  }
  0x58   : > { %s419_s4 = sshll.u32 %s489_s13, 4  ;;  %s420_s4 = int_to_ptr.vmem [resolvable:$false] %s419_s4 }
  0x59   : > { %p417_p9 = pnand %p416_p6, %p597_p8  ;;  %s421_s5 = scalar_lea.vmem %s420_s4, 256 }
  0x5a   : > { %p422_p13 = scmp.lt.s32.totalorder %s664_s19, %s420_s4  ;;  %p423_p0 = scmp.lt.s32.totalorder %s421_s5, %s415_s3 }
  0x5b   : > { %p418_p12 = pneg %p417_p9 }
  0x5c   : > { %p424_p5 = por %p423_p0, %p422_p13 }
  0x5e   : > { %p425_p10 = pnand %p424_p5, %p418_p12 }
  0xe4   : > { %v175_v2 = vpop.xlane.xlu0 %174 }
  0xe5   : > { %v176_v3 = vmul.f32 0.0078125, %v175_v2 }
  0xe7   : > { %v177_v4 = vadd.f32 1e-06, %v176_v3 }
  0xe9   : > { %355 = vrsqrt.f32 %v177_v4 }
  0xf3   : > { %v356_v5 = vpop.eup %355 }
  0xf4   : > { %v180_v7 = vmul.f32 %v356_v5, %v172_v0 }
  0xf6   : > { %v187_v8 = vmul.f32 %v293_v6, %v180_v7 }
  0xf8   : > { %188 = vst [vmem:[%s171_s17] sm:$0xff] %v187_v8 }
  0xf9   : > { %428 = shalt.err (!%p425_p10)
}
  0xfa   : > { %s429_s6 = scalar_lea.hbm %s662_s28, 128  ;;  %s433_s21 = scalar_lea.hbm %s708_s2, 256 }
  0xfb   : > { %p430_p1 = scmp.ne.s32.totalorder %s662_s28, %s429_s6  ;;  %p434_p3 = scmp.lt.u32.totalorder %s662_s28, %s708_s2 }
  0xfc   : > { %p435_p4 = scmp.lt.u32.totalorder %s433_s21, %s429_s6  ;;  %p437_p6 = scmp.lt.u32.totalorder %s429_s6, %s662_s28 }
  0xfd   : > { %p431_p2 = pnand %p430_p1, %p597_p8 }
  0xfe   : > { %p436_p11 = por %p435_p4, %p434_p3 }
  0xff   : > { %p432_p7 = pneg %p431_p2 }
 0x100   : > { %p438_p9 = por %p437_p6, %p436_p11 }
 0x102   : > { %p439_p12 = pnand %p438_p9, %p432_p7 }
 0x104   : > { %442 = shalt.err (!%p439_p12)
}
 0x105   : > { %304 = dma.vmem_to_hbm [thread:$0]  (%p597_p8), %s664_s19, 128, %s662_s28, %s190_s30  }
 0x106 PF: > { %s215_s26 = sand.u32 1, %s473_s9   ;;  %p727_p13 = scmp.ne.s32.totalorder %s713_s16, 0 }
 0x107   : > { %p728_p0 = scmp.ge.s32.totalorder %s485_s12, 2  ;;  %s216_s23 = scalar_lea.sflag [#allocation4], %s215_s26 }
 0x109   : > { %p315_p5 = pnand %p728_p0, %p727_p13 }
 0x10b   : > { %468 = dma.done.wait (!%p315_p5), %s216_s23, 128  }
 0x10c   : > { %470 = vsyncadd (!%p315_p5), %s216_s23, 4294967168  ;;  %p16_p10 = scmp.ge.s32.totalorder %s553_s20, 4   ;;  %s729_s9 = smov %s477_s10 }
 0x10d   : > { %s730_s10 = smov %s481_s11  ;;  %s731_s11 = smov %s589_s8 }
 0x10e   : > { %s732_s12 = smov %s553_s20  ;;  %18 = sbr.rel (!%p16_p10) target bundleno = 6 (0x6), region = 77 }
 0x115   :  { %221 = vsyncpa [#allocation3], 1 }
 0x116   :  { %223 = vsyncpa [#allocation3 + $0x1], 1 }
 0x117   :  { %224 = vsyncpa [#allocation6], 1 }
 0x118   :  { %225 = vsyncpa [#allocation4], 1 }
 0x119   :  { %227 = vsyncpa [#allocation4 + $0x1], 1 }

</bundles_post_ra>
